<compile_context>
chip_gen: v7x
topology: tpu7x:2x2x1
jax: 0.10.0
libtpu: 0.0.40
codegen_flags: <defaults>
</compile_context>

<pallas_src>
import jax
import jax.numpy as jnp
from jax.experimental import pallas as pl
from jax.experimental.pallas import tpu as pltpu


# ----------------------------- math helpers --------------------------------

def _erf(x):
    # Abramowitz & Stegun 7.1.26 rational approximation, max abs error ~1.5e-7.
    a1, a2, a3, a4, a5 = (0.254829592, -0.284496736, 1.421413741,
                          -1.453152027, 1.061405429)
    p = 0.3275911
    s = jnp.where(x >= 0.0, 1.0, -1.0)
    ax = jnp.abs(x)
    t = 1.0 / (1.0 + p * ax)
    poly = ((((a5 * t + a4) * t + a3) * t + a2) * t + a1) * t
    return s * (1.0 - poly * jnp.exp(-ax * ax))


def _gelu_exact(x):
    # Matches torch.nn.GELU() (exact erf form) to ~1e-7.
    return 0.5 * x * (1.0 + _erf(x * 0.7071067811865476))


# ------------------------------- kernel -------------------------------------

def _mlp_kernel(x_ref, w1_ref, b1_ref, w2_ref, b2_ref, o_ref, acc_ref):
    # x:  (tm, C_in)    w1: (C_in, th)   b1: (1, th)
    # w2: (th, C_out)   b2: (1, C_out)   o:  (tm, C_out)   acc: (tm, C_out) f32
    k = pl.program_id(1)

    @pl.when(k == 0)
    def _():
        acc_ref[...] = jnp.zeros_like(acc_ref)

    # fc1 slab for this hidden tile, bias, exact GELU -- all stays in
    # VMEM/vregs in f32 regardless of the storage dtype.
    h = jnp.dot(x_ref[...], w1_ref[...], preferred_element_type=jnp.float32)
    h = _gelu_exact(h + b1_ref[...].astype(jnp.float32))
    # Dropout(p=0.0) is the identity -> nothing to do.

    # fc2 partial product over the hidden (reduction) tile.
    acc_ref[...] += jnp.dot(h.astype(w2_ref.dtype), w2_ref[...],
                            preferred_element_type=jnp.float32)

    @pl.when(k == pl.num_programs(1) - 1)
    def _():
        o_ref[...] = (acc_ref[...]
                      + b2_ref[...].astype(jnp.float32)).astype(o_ref.dtype)


# ------------------------------- wrapper ------------------------------------

def _pick_tile(dim, candidates):
    for c in candidates:
        if dim >= c and dim % c == 0:
            return c
    return dim  # fall back to the full dimension (always a legal block)


def mlp_forward(x, params):
    """Fused Pallas equivalent of Mlp.forward (exact GELU, dropout p=0)."""
    orig_shape = x.shape
    c_in = orig_shape[-1]
    m = 1
    for d in orig_shape[:-1]:
        m *= d
    x2 = x.reshape(m, c_in)

    w1, b1 = params["w_fc1"], params["b_fc1"]   # (C_in, H), (1, H)
    w2, b2 = params["w_fc2"], params["b_fc2"]   # (H, C_out), (1, C_out)
    hidden = w1.shape[1]
    c_out = w2.shape[1]

    # Row tile (parallel) and hidden tile (reduction). Candidates are
    # multiples of 8 / 128 so blocks obey the (8, 128) constraint; fallback is
    # the full dimension which is always legal. Large tiles amortize the
    # ~0.35us per-grid-step overhead while staying well under the VMEM limit.
    tm = _pick_tile(m, (512, 256, 128, 64, 32, 16, 8))
    th = _pick_tile(hidden, (1024, 512, 256, 128))
    grid = (m // tm, hidden // th)

    cost = pl.CostEstimate(
        flops=2 * m * c_in * hidden + 2 * m * hidden * c_out,
        transcendentals=m * hidden,  # exp inside the erf/GELU
        bytes_accessed=x2.dtype.itemsize * (x2.size + m * c_out)
        + w1.dtype.itemsize * (w1.size + b1.size + w2.size + b2.size),
    )

    out = pl.pallas_call(
        _mlp_kernel,
        out_shape=jax.ShapeDtypeStruct((m, c_out), x.dtype),
        grid=grid,
        in_specs=[
            pl.BlockSpec((tm, c_in), lambda i, k: (i, 0)),    # x rows
            pl.BlockSpec((c_in, th), lambda i, k: (0, k)),    # fc1 weight slab
            pl.BlockSpec((1, th), lambda i, k: (0, k)),       # fc1 bias slab
            pl.BlockSpec((th, c_out), lambda i, k: (k, 0)),   # fc2 weight slab
            pl.BlockSpec((1, c_out), lambda i, k: (0, 0)),    # fc2 bias
        ],
        out_specs=pl.BlockSpec((tm, c_out), lambda i, k: (i, 0)),
        scratch_shapes=[pltpu.VMEM((tm, c_out), jnp.float32)],
        compiler_params=pltpu.CompilerParams(
            dimension_semantics=("parallel", "arbitrary"),
            vmem_limit_bytes=64 << 20),
        cost_estimate=cost,
    )(x2, w1, b1, w2, b2)

    return out.reshape(orig_shape[:-1] + (c_out,))


# ------------------------------ reference -----------------------------------

def mlp_reference(x, params):
    h = x @ params["w_fc1"] + params["b_fc1"][0]
    h = jax.nn.gelu(h, approximate=False)        # exact erf GELU == nn.GELU()
    return h @ params["w_fc2"] + params["b_fc2"][0]


# -------------------------------- main ---------------------------------------

if __name__ == "__main__":
    B, L = 2, 8
    in_features = 32
    hidden_features = 128      # typical 4x MLP expansion
    out_features = 32

    key = jax.random.PRNGKey(0)
    kx, kw1, kb1, kw2, kb2 = jax.random.split(key, 5)

    x = jax.random.normal(kx, (B, L, in_features), dtype=jnp.float32)

    # nn.Linear-shaped parameters, stored transposed as (in, out).
    params = {
        "w_fc1": (jax.random.normal(kw1, (in_features, hidden_features),
                                    dtype=jnp.float32)
                  * (1.0 / jnp.sqrt(in_features))),
        "b_fc1": jax.random.normal(kb1, (1, hidden_features),
                                   dtype=jnp.float32) * 0.01,
        "w_fc2": (jax.random.normal(kw2, (hidden_features, out_features),
                                    dtype=jnp.float32)
                  * (1.0 / jnp.sqrt(hidden_features))),
        "b_fc2": jax.random.normal(kb2, (1, out_features),
                                   dtype=jnp.float32) * 0.01,
    }

    out = mlp_forward(x, params)
    out = jax.block_until_ready(out)

    ref = mlp_reference(x, params)
    assert out.shape == (B, L, out_features)
    assert jnp.allclose(out, ref, atol=1e-4, rtol=1e-4), "mismatch vs reference"

    print("KERNEL_OK")
</pallas_src>

<mosaic_0001>
module attributes {stable_mosaic.version = 11 : i64} {
  func.func @_mlp_kernel(%arg0: i32, %arg1: i32, %arg2: memref<16x32xf32, #tpu.memory_space<vmem>>, %arg3: memref<32x128xf32, #tpu.memory_space<vmem>>, %arg4: memref<1x128xf32, #tpu.memory_space<vmem>>, %arg5: memref<128x32xf32, #tpu.memory_space<vmem>>, %arg6: memref<1x32xf32, #tpu.memory_space<vmem>>, %arg7: memref<16x32xf32, #tpu.memory_space<vmem>>, %arg8: memref<16x32xf32, #tpu.memory_space<vmem>>) attributes {dimension_semantics = [#tpu.dimension_semantics<parallel>, #tpu.dimension_semantics<arbitrary>], iteration_bounds = array<i64: 1, 1>, scalar_prefetch = 0 : i64, scratch_operands = 1 : i64, tpu.core_type = #tpu.core_type<tc>, window_params = [{transform_indices = @transform_0, window_bounds = array<i64: 16, 32>}, {transform_indices = @transform_1, window_bounds = array<i64: 32, 128>}, {transform_indices = @transform_2, window_bounds = array<i64: 1, 128>}, {transform_indices = @transform_3, window_bounds = array<i64: 128, 32>}, {pipeline_mode = #tpu.pipeline_mode<synchronous>, transform_indices = @transform_4, window_bounds = array<i64: 1, 32>}, {transform_indices = @transform_5, window_bounds = array<i64: 16, 32>}]} {
    %c0_i32 = arith.constant 0 : i32
    %0 = arith.cmpi eq, %arg1, %c0_i32 : i32
    %1 = arith.extui %0 : i1 to i32
    %c0_i32_0 = arith.constant 0 : i32
    %2 = arith.cmpi ne, %1, %c0_i32_0 : i32
    scf.if %2 {
      %cst_31 = arith.constant 0.000000e+00 : f32
      %58 = vector.broadcast %cst_31 : f32 to vector<16x32xf32>
      %c0_32 = arith.constant 0 : index
      %c0_33 = arith.constant 0 : index
      %59 = vector.load %arg8[%c0_32, %c0_33] : memref<16x32xf32, #tpu.memory_space<vmem>>, vector<16x32xf32>
      tpu.vector_store %arg8[%c0_32, %c0_33], %58 {strides = array<i32>} : memref<16x32xf32, #tpu.memory_space<vmem>>, vector<16x32xf32>,
    } else {
    }
    %c0 = arith.constant 0 : index
    %c0_1 = arith.constant 0 : index
    %3 = vector.load %arg2[%c0, %c0_1] : memref<16x32xf32, #tpu.memory_space<vmem>>, vector<16x32xf32>
    %c0_2 = arith.constant 0 : index
    %c0_3 = arith.constant 0 : index
    %4 = vector.load %arg3[%c0_2, %c0_3] : memref<32x128xf32, #tpu.memory_space<vmem>>, vector<32x128xf32>
    %cst = arith.constant dense<0.000000e+00> : vector<16x128xf32>
    %5 = tpu.matmul %3, %4, %cst {dimension_numbers = #tpu.dot_dimension_numbers<[1], [0], [0], [1], [0, 0, 1, 1], [], []>} : vector<16x32xf32>, vector<32x128xf32>, vector<16x128xf32> -> vector<16x128xf32>
    %c0_4 = arith.constant 0 : index
    %c0_5 = arith.constant 0 : index
    %6 = vector.load %arg4[%c0_4, %c0_5] : memref<1x128xf32, #tpu.memory_space<vmem>>, vector<1x128xf32>
    %7 = vector.broadcast %6 : vector<1x128xf32> to vector<16x128xf32>
    %8 = arith.addf %5, %7 : vector<16x128xf32>
    %cst_6 = arith.constant 5.000000e-01 : f32
    %9 = vector.broadcast %cst_6 : f32 to vector<16x128xf32>
    %10 = arith.mulf %9, %8 : vector<16x128xf32>
    %cst_7 = arith.constant 0.707106769 : f32
    %11 = vector.broadcast %cst_7 : f32 to vector<16x128xf32>
    %12 = arith.mulf %8, %11 : vector<16x128xf32>
    %cst_8 = arith.constant 0.000000e+00 : f32
    %13 = vector.broadcast %cst_8 : f32 to vector<16x128xf32>
    %14 = arith.cmpf oge, %12, %13 : vector<16x128xf32>
    %cst_9 = arith.constant 1.000000e+00 : f32
    %cst_10 = arith.constant -1.000000e+00 : f32
    %15 = vector.broadcast %cst_9 : f32 to vector<16x128xf32>
    %16 = vector.broadcast %cst_10 : f32 to vector<16x128xf32>
    %17 = arith.select %14, %15, %16 : vector<16x128xi1>, vector<16x128xf32>
    %18 = math.absf %12 : vector<16x128xf32>
    %cst_11 = arith.constant 0.327591091 : f32
    %19 = vector.broadcast %cst_11 : f32 to vector<16x128xf32>
    %20 = arith.mulf %19, %18 : vector<16x128xf32>
    %cst_12 = arith.constant 1.000000e+00 : f32
    %21 = vector.broadcast %cst_12 : f32 to vector<16x128xf32>
    %22 = arith.addf %21, %20 : vector<16x128xf32>
    %cst_13 = arith.constant 1.000000e+00 : f32
    %23 = vector.broadcast %cst_13 : f32 to vector<16x128xf32>
    %24 = arith.divf %23, %22 : vector<16x128xf32>
    %cst_14 = arith.constant 1.06140542 : f32
    %25 = vector.broadcast %cst_14 : f32 to vector<16x128xf32>
    %26 = arith.mulf %25, %24 : vector<16x128xf32>
    %cst_15 = arith.constant -1.45315206 : f32
    %27 = vector.broadcast %cst_15 : f32 to vector<16x128xf32>
    %28 = arith.addf %26, %27 : vector<16x128xf32>
    %29 = arith.mulf %28, %24 : vector<16x128xf32>
    %cst_16 = arith.constant 1.42141378 : f32
    %30 = vector.broadcast %cst_16 : f32 to vector<16x128xf32>
    %31 = arith.addf %29, %30 : vector<16x128xf32>
    %32 = arith.mulf %31, %24 : vector<16x128xf32>
    %cst_17 = arith.constant -0.284496725 : f32
    %33 = vector.broadcast %cst_17 : f32 to vector<16x128xf32>
    %34 = arith.addf %32, %33 : vector<16x128xf32>
    %35 = arith.mulf %34, %24 : vector<16x128xf32>
    %cst_18 = arith.constant 0.254829586 : f32
    %36 = vector.broadcast %cst_18 : f32 to vector<16x128xf32>
    %37 = arith.addf %35, %36 : vector<16x128xf32>
    %38 = arith.mulf %37, %24 : vector<16x128xf32>
    %cst_19 = arith.constant 0.000000e+00 : f32
    %39 = vector.broadcast %cst_19 : f32 to vector<16x128xf32>
    %40 = arith.subf %39, %18 : vector<16x128xf32>
    %41 = arith.mulf %40, %18 : vector<16x128xf32>
    %42 = math.exp %41 : vector<16x128xf32>
    %43 = arith.mulf %38, %42 : vector<16x128xf32>
    %cst_20 = arith.constant 1.000000e+00 : f32
    %44 = vector.broadcast %cst_20 : f32 to vector<16x128xf32>
    %45 = arith.subf %44, %43 : vector<16x128xf32>
    %46 = arith.mulf %17, %45 : vector<16x128xf32>
    %cst_21 = arith.constant 1.000000e+00 : f32
    %47 = vector.broadcast %cst_21 : f32 to vector<16x128xf32>
    %48 = arith.addf %47, %46 : vector<16x128xf32>
    %49 = arith.mulf %10, %48 : vector<16x128xf32>
    %c0_22 = arith.constant 0 : index
    %c0_23 = arith.constant 0 : index
    %50 = vector.load %arg8[%c0_22, %c0_23] : memref<16x32xf32, #tpu.memory_space<vmem>>, vector<16x32xf32>
    %c0_24 = arith.constant 0 : index
    %c0_25 = arith.constant 0 : index
    %51 = vector.load %arg5[%c0_24, %c0_25] : memref<128x32xf32, #tpu.memory_space<vmem>>, vector<128x32xf32>
    %cst_26 = arith.constant dense<0.000000e+00> : vector<16x32xf32>
    %52 = tpu.matmul %49, %51, %cst_26 {dimension_numbers = #tpu.dot_dimension_numbers<[1], [0], [0], [1], [0, 0, 1, 1], [], []>} : vector<16x128xf32>, vector<128x32xf32>, vector<16x32xf32> -> vector<16x32xf32>
    %53 = arith.addf %50, %52 : vector<16x32xf32>
    %c0_27 = arith.constant 0 : index
    %c0_28 = arith.constant 0 : index
    %54 = vector.load %arg8[%c0_27, %c0_28] : memref<16x32xf32, #tpu.memory_space<vmem>>, vector<16x32xf32>
    tpu.vector_store %arg8[%c0_27, %c0_28], %53 {strides = array<i32>} : memref<16x32xf32, #tpu.memory_space<vmem>>, vector<16x32xf32>,
    %c0_i32_29 = arith.constant 0 : i32
    %55 = arith.cmpi eq, %arg1, %c0_i32_29 : i32
    %56 = arith.extui %55 : i1 to i32
    %c0_i32_30 = arith.constant 0 : i32
    %57 = arith.cmpi ne, %56, %c0_i32_30 : i32
    scf.if %57 {
      %c0_31 = arith.constant 0 : index
      %c0_32 = arith.constant 0 : index
      %58 = vector.load %arg8[%c0_31, %c0_32] : memref<16x32xf32, #tpu.memory_space<vmem>>, vector<16x32xf32>
      %c0_33 = arith.constant 0 : index
      %c0_34 = arith.constant 0 : index
      %59 = vector.load %arg6[%c0_33, %c0_34] : memref<1x32xf32, #tpu.memory_space<vmem>>, vector<1x32xf32>
      %60 = vector.broadcast %59 : vector<1x32xf32> to vector<16x32xf32>
      %61 = arith.addf %58, %60 : vector<16x32xf32>
      %c0_35 = arith.constant 0 : index
      %c0_36 = arith.constant 0 : index
      %62 = vector.load %arg7[%c0_35, %c0_36] : memref<16x32xf32, #tpu.memory_space<vmem>>, vector<16x32xf32>
      tpu.vector_store %arg7[%c0_35, %c0_36], %61 {strides = array<i32>} : memref<16x32xf32, #tpu.memory_space<vmem>>, vector<16x32xf32>,
    } else {
    }
    return
  }
  func.func @transform_0(%arg0: i32, %arg1: i32) -> (i32, i32) {
    %c0_i32 = arith.constant 0 : i32
    %c0_i32_0 = arith.constant 0 : i32
    return %arg0, %c0_i32 : i32, i32
  }
  func.func @transform_1(%arg0: i32, %arg1: i32) -> (i32, i32) {
    %c0_i32 = arith.constant 0 : i32
    %c0_i32_0 = arith.constant 0 : i32
    return %c0_i32, %arg1 : i32, i32
  }
  func.func @transform_2(%arg0: i32, %arg1: i32) -> (i32, i32) {
    %c0_i32 = arith.constant 0 : i32
    %c0_i32_0 = arith.constant 0 : i32
    return %c0_i32, %arg1 : i32, i32
  }
  func.func @transform_3(%arg0: i32, %arg1: i32) -> (i32, i32) {
    %c0_i32 = arith.constant 0 : i32
    %c0_i32_0 = arith.constant 0 : i32
    return %arg1, %c0_i32 : i32, i32
  }
  func.func @transform_4(%arg0: i32, %arg1: i32) -> (i32, i32) {
    %c0_i32 = arith.constant 0 : i32
    %c0_i32_0 = arith.constant 0 : i32
    %c0_i32_1 = arith.constant 0 : i32
    return %c0_i32, %c0_i32_0 : i32, i32
  }
  func.func @transform_5(%arg0: i32, %arg1: i32) -> (i32, i32) {
    %c0_i32 = arith.constant 0 : i32
    %c0_i32_0 = arith.constant 0 : i32
    return %arg0, %c0_i32 : i32, i32
  }
}

</mosaic_0001>

<bundles_post_ra>
// kernel: tpu_custom_call.1
= control target key start
LH: loop header
LB: loop body
LE: loop exit
PB: predicated region body
PF: predicated region fallthrough
CT: control target
= control target key end

     0   :  { %10 = vsyncpa [#allocation4], 0  ;;  %s784_s0 = inlined_call_operand.hbm [shape: f32[16,32], index: 0, kind: input, shape index: {}]   ;;  %s785_s1 = inlined_call_operand.hbm [shape: f32[32,128], index: 1, kind: input, shape index: {}]   ;;  %s786_s2 = inlined_call_operand.hbm [shape: f32[1,128], index: 2, kind: input, shape index: {}]   ;;  %s787_s3 = inlined_call_operand.hbm [shape: f32[128,32], index: 3, kind: input, shape index: {}]   ;;  %s788_s4 = inlined_call_operand.hbm [shape: f32[1,32], index: 4, kind: input, shape index: {}]   ;;  %s789_s5 = inlined_call_operand.hbm [shape: f32[16,32], index: 5, kind: output, shape index: {}]  }
   0x1   :  { %11 = vsyncpa [#allocation7], 0 }
   0x2   :  { %12 = vsyncpa [#allocation10], 0 }
   0x3   :  { %13 = vsyncpa [#allocation5], 0  ;;  %s645_s18 = smov [#allocation6]   ;;  %s646_s20 = smov [#allocation9]  }
   0x4   :  { %s31_s19 = sshll.u32 %s645_s18, 4  ;;  %s53_s21 = sshll.u32 %s646_s20, 4  ;;  %s32_s19 = int_to_ptr.vmem [resolvable:$true] %s31_s19  ;;  %s685_s21 = int_to_ptr.vmem [resolvable:$true] %s53_s21 }
   0x5   :  { %s505_s24 = scalar_lea.hbm %s785_s1, 512 }
   0x6   :  { %p506_p0 = scmp.ne.s32.totalorder %s785_s1, %s505_s24  ;;  %p509_p1 = scmp.lt.u32.totalorder %s505_s24, %s785_s1 }
   0x8   :  { %p511_p2 = pnand %p509_p1, %p506_p0 }
   0xa   :  { %514 = shalt.err (!%p511_p2)
}
   0xb   :  { %s515_s29 = scalar_lea.vmem %s32_s19, 512  ;;  %p520_p4 = scmp.lt.s32.totalorder %s32_s19, %s32_s19 }
   0xc   :  { %p516_p3 = scmp.ne.s32.totalorder %s32_s19, %s515_s29  ;;  %p521_p5 = scmp.lt.s32.totalorder %s515_s29, %s515_s29 }
   0xe   :  { %p522_p6 = por %p521_p5, %p520_p4 }
  0x10   :  { %p523_p7 = pnand %p522_p6, %p516_p3 }
  0x12   :  { %526 = shalt.err (!%p523_p7)
}
  0x13   :  { %s647_s30 = smov 128   ;;  %s648_s6 = smov 8  }
  0x14   :  { %37 = dma.hbm_to_vmem [thread:$0]  %s785_s1, 512, %s32_s19, [#allocation7], %s647_s30, %s647_s30, %s648_s6  }
  0x15   :  { %s527_s11 = scalar_lea.hbm %s787_s3, 2048 }
  0x16   :  { %p528_p8 = scmp.ne.s32.totalorder %s787_s3, %s527_s11  ;;  %p531_p9 = scmp.lt.u32.totalorder %s527_s11, %s787_s3 }
  0x18   :  { %p533_p10 = pnand %p531_p9, %p528_p8 }
  0x1a   :  { %536 = shalt.err (!%p533_p10)
}
  0x1b   :  { %s537_s16 = scalar_lea.vmem %s685_s21, 2048  ;;  %p542_p12 = scmp.lt.s32.totalorder %s685_s21, %s685_s21 }
  0x1c   :  { %p538_p11 = scmp.ne.s32.totalorder %s685_s21, %s537_s16  ;;  %p543_p13 = scmp.lt.s32.totalorder %s537_s16, %s537_s16 }
  0x1e   :  { %p544_p0 = por %p543_p13, %p542_p12 }
  0x20   :  { %p545_p1 = pnand %p544_p0, %p538_p11 }
  0x22   :  { %548 = shalt.err (!%p545_p1)
}
  0x23   :  { %59 = dma.hbm_to_vmem [thread:$0]  %s787_s3, 2048, %s685_s21, [#allocation10], %s647_s30, %s647_s30, %s648_s6  }
  0x24   :  { %s649_s18 = smov [#allocation3]   ;;  %s650_s20 = smov [#allocation8]  }
  0x25   :  { %s19_s19 = sshll.u32 %s649_s18, 4  ;;  %s44_s22 = sshll.u32 %s650_s20, 4  ;;  %s20_s19 = int_to_ptr.vmem [resolvable:$true] %s19_s19  ;;  %s45_s22 = int_to_ptr.vmem [resolvable:$true] %s44_s22 }
  0x26   :  { %s549_s25 = scalar_lea.hbm %s784_s0, 256 }
  0x27   :  { %p550_p2 = scmp.ne.s32.totalorder %s784_s0, %s549_s25  ;;  %p553_p3 = scmp.lt.u32.totalorder %s549_s25, %s784_s0 }
  0x29   :  { %p555_p4 = pnand %p553_p3, %p550_p2 }
  0x2b   :  { %558 = shalt.err (!%p555_p4)
}
  0x2c   :  { %s559_s3 = scalar_lea.vmem %s20_s19, 256  ;;  %p564_p6 = scmp.lt.s32.totalorder %s20_s19, %s20_s19 }
  0x2d   :  { %p560_p5 = scmp.ne.s32.totalorder %s20_s19, %s559_s3  ;;  %p565_p7 = scmp.lt.s32.totalorder %s559_s3, %s559_s3 }
  0x2f   :  { %p566_p8 = por %p565_p7, %p564_p6 }
  0x31   :  { %p567_p9 = pnand %p566_p8, %p560_p5 }
  0x33   :  { %570 = shalt.err (!%p567_p9)
}
  0x34   :  { %25 = dma.hbm_to_vmem [thread:$0]  %s784_s0, 256, %s20_s19, [#allocation4], %s647_s30, %s647_s30, %s648_s6  }
  0x35   :  { %s571_s10 = scalar_lea.hbm %s786_s2, 16 }
  0x36   :  { %p572_p10 = scmp.ne.s32.totalorder %s786_s2, %s571_s10  ;;  %p575_p11 = scmp.lt.u32.totalorder %s571_s10, %s786_s2 }
  0x38   :  { %p577_p12 = pnand %p575_p11, %p572_p10 }
  0x3a   :  { %580 = shalt.err (!%p577_p12)
}
  0x3b   :  { %s581_s15 = scalar_lea.vmem %s45_s22, 16  ;;  %s585_s16 = scalar_lea.vmem %s45_s22, 32 }
  0x3c   :  { %p582_p13 = scmp.ne.s32.totalorder %s45_s22, %s581_s15  ;;  %p586_p0 = scmp.lt.s32.totalorder %s45_s22, %s45_s22 }
  0x3d   :  { %p587_p1 = scmp.lt.s32.totalorder %s585_s16, %s581_s15 }
  0x3f   :  { %p588_p2 = por %p587_p1, %p586_p0 }
  0x41   :  { %p589_p3 = pnand %p588_p2, %p582_p13 }
  0x43   :  { %592 = shalt.err (!%p589_p3)
}
  0x44   :  { %47 = dma.hbm_to_vmem [thread:$0]  %s786_s2, 16, %s45_s22, [#allocation7]  }
  0x45   :  { %s651_s17 = smov [#allocation11]   ;;  %s593_s23 = scalar_lea.hbm %s788_s4, 16 }
  0x46   :  { %s66_s18 = sshll.u32 %s651_s17, 4  ;;  %p594_p4 = scmp.ne.s32.totalorder %s788_s4, %s593_s23  ;;  %s67_s18 = int_to_ptr.vmem [resolvable:$true] %s66_s18 }
  0x47   :  { %p597_p5 = scmp.lt.u32.totalorder %s593_s23, %s788_s4 }
  0x49   :  { %p599_p6 = pnand %p597_p5, %p594_p4 }
  0x4b   :  { %602 = shalt.err (!%p599_p6)
}
  0x4c   :  { %s603_s28 = scalar_lea.vmem %s67_s18, 16  ;;  %s607_s2 = scalar_lea.vmem %s67_s18, 32 }
  0x4d   :  { %p604_p7 = scmp.ne.s32.totalorder %s67_s18, %s603_s28  ;;  %p608_p8 = scmp.lt.s32.totalorder %s67_s18, %s67_s18 }
  0x4e   :  { %p609_p9 = scmp.lt.s32.totalorder %s607_s2, %s603_s28 }
  0x50   :  { %p610_p10 = por %p609_p9, %p608_p8 }
  0x52   :  { %p611_p11 = pnand %p610_p10, %p604_p7 }
  0x54   :  { %614 = shalt.err (!%p611_p11)
}
  0x55   :  { %69 = dma.hbm_to_vmem [thread:$0]  %s788_s4, 16, %s67_s18, [#allocation10]  }
  0x56   :  { %637 = dma.done.wait [#allocation4], 256  }
  0x57   :  { %638 = vsyncadd [#allocation4], 4294967040 }
  0x58   :  { %639 = dma.done.wait [#allocation7], 528  }
  0x59   :  { %640 = vsyncadd [#allocation7], 4294966768 }
  0x5a   :  { %641 = dma.done.wait [#allocation10], 2064  }
  0x5b   :  { %642 = vsyncadd [#allocation10], 4294965232  ;;  %vm89_vm0 = vcmask 261120   ;;  %v94_v0 = vld [vmem:[#allocation6] sm:$0xff]  ;;  %v95_v1 = vld [vmem:[#allocation6 + $0x8] sm:$0xff]  ;;  %v652_v32 = vmov 0.0  }
  0x5c   :  { %v96_v2 = vld [vmem:[#allocation6 + $0x10] sm:$0xff]  ;;  %v447_v3 = vpack.c.bf16 %v95_v1, %v94_v0  ;;  %v97_v4 = vld [vmem:[#allocation6 + $0x18] sm:$0xff]  ;;  %v243_v8 = vld [vmem:[#allocation9] sm:$0xff]  ;;  %91 = vst.msk [vmem:[#allocation2 + $0x8] sm:$0xff] %vm89_vm0, %v652_v32  ;;  %s654_s4 = smov [#allocation12]  }
  0x5d   :  { %v92_v5 = vld [vmem:[#allocation3] sm:$0xff]  ;;  %v451_v6 = vpack.c.bf16 %v97_v4, %v96_v2  ;;  %v93_v7 = vld [vmem:[#allocation3 + $0x8] sm:$0xff]  ;;  %v247_v14 = vld [vmem:[#allocation9 + $0x20] sm:$0xff]  ;;  %90 = vst.msk [vmem:[#allocation2] sm:$0xff] %vm89_vm0, %v652_v32  ;;  %s359_s3 = sshll.u32 %s654_s4, 4  ;;  %s360_s3 = int_to_ptr.vmem [resolvable:$true] %s359_s3 }
  0x5e   :  { %409 = vmatprep.mubr.msk.f32.mxu0 %vm89_vm0, %v92_v5  ;;  %448 = vmatprep.subr.bf16.mxu0 %v447_v3  ;;  %v244_v9 = vld [vmem:[#allocation9 + $0x8] sm:$0xff]  ;;  %v245_v10 = vld [vmem:[#allocation9 + $0x10] sm:$0xff]  ;;  %v246_v12 = vld [vmem:[#allocation9 + $0x18] sm:$0xff]  ;;  %s615_s21 = scalar_lea.vmem %s360_s3, 256  ;;  %p620_p13 = scmp.lt.s32.totalorder %s360_s3, %s360_s3 }
  0x5f   :  { %450 = vmatpush3.bf16.msra.mxu0 %v447_v3  ;;  %v455_v11 = vpack.c.bf16 %v244_v9, %v243_v8  ;;  %v459_v13 = vpack.c.bf16 %v246_v12, %v245_v10  ;;  %v248_v15 = vld [vmem:[#allocation9 + $0x28] sm:$0xff]  ;;  %v249_v17 = vld [vmem:[#allocation9 + $0x30] sm:$0xff]  ;;  %v250_v18 = vld [vmem:[#allocation9 + $0x38] sm:$0xff]  ;;  %p616_p12 = scmp.ne.s32.totalorder %s360_s3, %s615_s21  ;;  %p621_p0 = scmp.lt.s32.totalorder %s615_s21, %s615_s21 }
  0x60   :  { %452 = vmatprep.subr.bf16.mxu0 %v451_v6  ;;  %v463_v16 = vpack.c.bf16 %v248_v15, %v247_v14  ;;  %v467_v19 = vpack.c.bf16 %v250_v18, %v249_v17  ;;  %v251_v20 = vld [vmem:[#allocation9 + $0x40] sm:$0xff]  ;;  %v252_v21 = vld [vmem:[#allocation9 + $0x48] sm:$0xff]  ;;  %v253_v23 = vld [vmem:[#allocation9 + $0x50] sm:$0xff] }
  0x61   :  { %456 = vmatprep.subr.bf16.mxu1 %v455_v11  ;;  %v471_v22 = vpack.c.bf16 %v252_v21, %v251_v20  ;;  %v254_v24 = vld [vmem:[#allocation9 + $0x58] sm:$0xff]  ;;  %v255_v26 = vld [vmem:[#allocation9 + $0x60] sm:$0xff]  ;;  %v256_v27 = vld [vmem:[#allocation9 + $0x68] sm:$0xff]  ;;  %p622_p1 = por %p621_p0, %p620_p13 }
  0x62   :  { %458 = vmatpush3.bf16.msra.mxu1 %v455_v11  ;;  %v475_v25 = vpack.c.bf16 %v254_v24, %v253_v23  ;;  %v479_v28 = vpack.c.bf16 %v256_v27, %v255_v26  ;;  %v257_v29 = vld [vmem:[#allocation9 + $0x70] sm:$0xff]  ;;  %v258_v30 = vld [vmem:[#allocation9 + $0x78] sm:$0xff] }
  0x63   :  { %454 = vmatpush3.bf16.msra.mxu0 %v451_v6  ;;  %460 = vmatprep.subr.bf16.mxu1 %v459_v13  ;;  %v483_v31 = vpack.c.bf16 %v258_v30, %v257_v29  ;;  %v373_v33 = vld [vmem:[#allocation8] ss:$0 sm:$0xff]  ;;  %p623_p2 = pnand %p622_p1, %p616_p12 }
  0x64   :  { %v241_v26 = vld [vmem:[#allocation2] sm:$0xff] }
  0x66   :  { %410 = vmatmul.mubr.msk.f32.vlgmr.msra.gmra.mrb[0].mxu0 %vm89_vm0, %v93_v7  ;;  %462 = vmatpush3.bf16.msra.mxu1 %v459_v13  ;;  %v653_v13 = vmov -1.0  }
  0x67   :  { %464 = vmatprep.subr.bf16.mxu1 %v463_v16 }
  0x6a   :  { %466 = vmatpush3.bf16.msra.mxu1 %v463_v16 }
  0x6b   :  { %468 = vmatprep.subr.bf16.mxu1 %v467_v19 }
  0x6e   :  { %470 = vmatpush3.bf16.msra.mxu1 %v467_v19 }
  0x6f   :  { %472 = vmatprep.subr.bf16.mxu1 %v471_v22 }
  0x72   :  { %474 = vmatpush3.bf16.msra.mxu1 %v471_v22 }
  0x73   :  { %476 = vmatprep.subr.bf16.mxu1 %v475_v25 }
  0x76   :  { %478 = vmatpush3.bf16.msra.mxu1 %v475_v25  ;;  %v242_v25 = vld [vmem:[#allocation2 + $0x8] sm:$0xff] }
  0x77   :  { %480 = vmatprep.subr.bf16.mxu1 %v479_v28 }
  0x7a   :  { %482 = vmatpush3.bf16.msra.mxu1 %v479_v28 }
  0x7b   :  { %484 = vmatprep.subr.bf16.mxu1 %v483_v31 }
  0x7e   :  { %486 = vmatpush3.bf16.msra.mxu1 %v483_v31  ;;  %v376_v31 = vld [vmem:[#allocation11] ss:$0 sm:$0xff] }
 0x139   :  { %v411_v34 = vpop.f32.mrb[0].mxu0 }
 0x13a   :  { %v184_v35 = vadd.f32 %v411_v34, %v373_v33  ;;  %v178_v36 = vpop.f32.mrb[1].mxu0 }
 0x13b   :  { %v179_v37 = vadd.f32 %v373_v33, %v178_v36 }
 0x13c   :  { %v190_v38 = vmul.f32 0.70710677, %v184_v35  ;;  %v188_v22 = vmul.f32 0.5, %v184_v35 }
 0x13d   :  { %v189_v39 = vmul.f32 0.70710677, %v179_v37  ;;  %v187_v20 = vmul.f32 0.5, %v179_v37 }
 0x13e   :  { %v196_v40 = vand.u32 2147483647, %v190_v38  ;;  %vm192_vm1 = vcmp.ge.f32.partialorder %v190_v38, 0.0 }
 0x13f   :  { %v195_v41 = vand.u32 2147483647, %v189_v39  ;;  %vm191_vm2 = vcmp.ge.f32.partialorder %v189_v39, 0.0  ;;  %v194_v14 = vsel %vm192_vm1, 1.0, %v653_v13 }
 0x140   :  { %v198_v42 = vmul.f32 0.3275911, %v196_v40  ;;  %v224_v46 = vsub.f32 0.0, %v196_v40  ;;  %v193_v16 = vsel %vm191_vm2, 1.0, %v653_v13 }
 0x141   :  { %v197_v43 = vmul.f32 0.3275911, %v195_v41  ;;  %v223_v47 = vsub.f32 0.0, %v195_v41 }
 0x142   :  { %v200_v44 = vadd.f32 1.0, %v198_v42  ;;  %v226_v49 = vmul.f32 %v224_v46, %v196_v40 }
 0x143   :  { %v199_v45 = vadd.f32 1.0, %v197_v43  ;;  %v225_v51 = vmul.f32 %v223_v47, %v195_v41 }
 0x144   :  { %497 = vrcp.f32 %v200_v44  ;;  %v229_v55 = vmul.f32 1.442695, %v226_v49 }
 0x145   :  { %499 = vrcp.f32 %v199_v45  ;;  %v227_v57 = vmul.f32 1.442695, %v225_v51 }
 0x146   :  { %501 = vpow2.f32 %v229_v55 }
 0x147   :  { %503 = vpow2.f32 %v227_v57 }
 0x14e   :  { %v498_v48 = vpop.eup %497 }
 0x14f   :  { %v500_v50 = vpop.eup %499  ;;  %v206_v52 = vmul.f32 1.0614054, %v498_v48 }
 0x150   :  { %v205_v53 = vmul.f32 1.0614054, %v500_v50  ;;  %v502_v7 = vpop.eup %501 }
 0x151   :  { %v208_v54 = vadd.f32 -1.4531521, %v206_v52  ;;  %v504_v9 = vpop.eup %503 }
 0x152   :  { %v207_v56 = vadd.f32 -1.4531521, %v205_v53 }
 0x153   :  { %v210_v58 = vmul.f32 %v498_v48, %v208_v54 }
 0x154   :  { %v209_v59 = vmul.f32 %v500_v50, %v207_v56 }
 0x155   :  { %v212_v60 = vadd.f32 1.4214138, %v210_v58 }
 0x156   :  { %v211_v61 = vadd.f32 1.4214138, %v209_v59 }
 0x157   :  { %v214_v62 = vmul.f32 %v498_v48, %v212_v60 }
 0x158   :  { %v213_v63 = vmul.f32 %v500_v50, %v211_v61 }
 0x159   :  { %v216_v0 = vadd.f32 -0.28449672, %v214_v62 }
 0x15a   :  { %v215_v1 = vadd.f32 -0.28449672, %v213_v63 }
 0x15b   :  { %v218_v2 = vmul.f32 %v498_v48, %v216_v0 }
 0x15c   :  { %v217_v3 = vmul.f32 %v500_v50, %v215_v1 }
 0x15d   :  { %v220_v4 = vadd.f32 0.2548296, %v218_v2 }
 0x15e   :  { %v219_v5 = vadd.f32 0.2548296, %v217_v3 }
 0x15f   :  { %v222_v6 = vmul.f32 %v498_v48, %v220_v4 }
 0x160   :  { %v221_v8 = vmul.f32 %v500_v50, %v219_v5 }
 0x161   :  { %v232_v10 = vmul.f32 %v502_v7, %v222_v6 }
 0x162   :  { %v231_v11 = vmul.f32 %v504_v9, %v221_v8 }
 0x163   :  { %v234_v12 = vsub.f32 1.0, %v232_v10 }
 0x164   :  { %v233_v15 = vsub.f32 1.0, %v231_v11 }
 0x165   :  { %v236_v17 = vmul.f32 %v234_v12, %v194_v14 }
 0x166   :  { %v235_v18 = vmul.f32 %v233_v15, %v193_v16 }
 0x167   :  { %v238_v19 = vadd.f32 1.0, %v236_v17 }
 0x168   :  { %v237_v21 = vadd.f32 1.0, %v235_v18 }
 0x169   :  { %v240_v24 = vmul.f32 %v238_v19, %v188_v22 }
 0x16a   :  { %v239_v23 = vmul.f32 %v237_v21, %v187_v20 }
 0x16c   :  { %444 = vmatprep.mubr.f32.mxu1 %v239_v23 }
 0x16d   :  { %445 = vmatmul.mubr.f32.vlgmr.msra.gmra.mrb[0].mxu1 %v240_v24 }
 0x240   :  { %v446_v27 = vpop.f32.mrb[0].mxu1 }
 0x241   :  { %v335_v28 = vadd.f32 %v446_v27, %v242_v25  ;;  %v325_v29 = vpop.f32.mrb[1].mxu1 }
 0x242   :  { %v334_v30 = vadd.f32 %v325_v29, %v241_v26 }
 0x243   :  { %337 = vst.msk [vmem:[#allocation2 + $0x8] sm:$0xff] %vm89_vm0, %v335_v28 }
 0x244   :  { %336 = vst.msk [vmem:[#allocation2] sm:$0xff] %vm89_vm0, %v334_v30 }
 0x24a   :  { %v342_v32 = vld [vmem:[#allocation2 + $0x8] sm:$0xff] }
 0x24b   :  { %v341_v33 = vld [vmem:[#allocation2] sm:$0xff]  ;;  %v351_v34 = vadd.f32 %v376_v31, %v342_v32 }
 0x24c   :  { %v350_v35 = vadd.f32 %v376_v31, %v341_v33 }
 0x24d   :  { %353 = vst.msk [vmem:[#allocation12 + $0x8] sm:$0xff] %vm89_vm0, %v351_v34 }
 0x24e   :  { %352 = vst.msk [vmem:[#allocation12] sm:$0xff] %vm89_vm0, %v350_v35 }
 0x24f   :  { %626 = shalt.err (!%p623_p2)
}
 0x250   :  { %s627_s9 = scalar_lea.hbm %s789_s5, 256 }
 0x251   :  { %p628_p3 = scmp.ne.s32.totalorder %s789_s5, %s627_s9  ;;  %p631_p4 = scmp.lt.u32.totalorder %s627_s9, %s789_s5 }
 0x253   :  { %p633_p5 = pnand %p631_p4, %p628_p3 }
 0x255   :  { %636 = shalt.err (!%p633_p5)
}
 0x256   :  { %365 = dma.vmem_to_hbm [thread:$0]  %s360_s3, 256, %s789_s5, [#allocation5], %s647_s30, %s647_s30, %s648_s6  }
 0x257   :  { %643 = dma.done.wait [#allocation5], 256  }
 0x258   :  { %644 = vsyncadd [#allocation5], 4294967040 }
 0x259   :  { %369 = vsyncpa [#allocation4], 1 }
 0x25a   :  { %370 = vsyncpa [#allocation7], 1 }
 0x25b   :  { %371 = vsyncpa [#allocation10], 1 }
 0x25c   :  { %372 = vsyncpa [#allocation5], 1 }

</bundles_post_ra>
